<compile_context>
chip_gen: v7x
topology: tpu7x:2x2x1
jax: 0.10.0
libtpu: 0.0.40
codegen_flags: <defaults>
</compile_context>

<pallas_src>
import math

import jax
import jax.numpy as jnp
from jax.experimental import pallas as pl
from jax.experimental.pallas import tpu as pltpu


def _round_up(v, m):
    return ((v + m - 1) // m) * m


def _gcn_kernel(x_ref, adj_ref, w_ref, b_ref, out_ref, support_ref):
    """One (batch, row-tile) grid step of: out = adj @ (x @ W) + bias."""
    # support = x @ W, computed once per batch.  The row-tile axis is the
    # inner, sequential ("arbitrary") grid axis, so the scratch stays valid
    # for every row tile of this batch and is refreshed when the batch
    # index advances (program_id(1) wraps back to 0).
    @pl.when(pl.program_id(1) == 0)
    def _():
        support_ref[...] = jnp.dot(
            x_ref[0], w_ref[...],
            preferred_element_type=jnp.float32).astype(support_ref.dtype)

    # out_tile = adj_tile @ support + bias   (f32 MXU accumulation)
    out = jnp.dot(adj_ref[0], support_ref[...],
                  preferred_element_type=jnp.float32) + b_ref[...]
    out_ref[0] = out.astype(out_ref.dtype)


def graph_convolution_forward(x, adj, weight, bias=None, *,
                              compute_dtype=jnp.float32,
                              row_tile=256):
    """x: [B, N, Fin], adj: [B, N, N], weight: [Fin, Fout], bias: [Fout] | None."""
    B, N, Fin = x.shape
    Fout = weight.shape[1]

    # Padding policy:
    #  * N only to a multiple of 8 (f32 sublane).  adj's lane dim stays at Np:
    #    the block's last dim equals the full array dim, so it is exempt from
    #    the divisible-by-128 rule.
    #  * Fout to a multiple of 128 -> lane-dense, unmasked output stores.
    #  * Fin to a multiple of 128 -> lane-dense x loads / aligned weight tile
    #    (cheap relative to the adj stream).
    Np = _round_up(N, 8)
    Fip = _round_up(Fin, 128)
    Fop = _round_up(Fout, 128)

    # Row tile over adjacency/output rows; keep Np an exact multiple of TM.
    if Np <= row_tile:
        TM = Np
    else:
        TM = _round_up(row_tile, 8)
        Np = _round_up(Np, TM)
    num_row_tiles = Np // TM

    x_p = jnp.pad(x.astype(compute_dtype),
                  ((0, 0), (0, Np - N), (0, Fip - Fin)))
    adj_p = jnp.pad(adj.astype(compute_dtype),
                    ((0, 0), (0, Np - N), (0, Np - N)))
    w_p = jnp.pad(weight.astype(compute_dtype),
                  ((0, Fip - Fin), (0, Fop - Fout)))
    if bias is None:
        b_p = jnp.zeros((1, Fop), dtype=jnp.float32)
    else:
        b_p = jnp.pad(bias.astype(jnp.float32).reshape(1, Fout),
                      ((0, 0), (0, Fop - Fout)))

    grid_spec = pltpu.PrefetchScalarGridSpec(
        num_scalar_prefetch=0,
        grid=(B, num_row_tiles),
        in_specs=[
            # x: full padded node-feature block, resident across row tiles.
            pl.BlockSpec((1, Np, Fip), lambda b, r: (b, 0, 0)),
            # adj: one (TM, Np) row tile per step — the streamed operand.
            pl.BlockSpec((1, TM, Np), lambda b, r: (b, r, 0)),
            # weight / bias: shared across the whole grid.
            pl.BlockSpec((Fip, Fop), lambda b, r: (0, 0)),
            pl.BlockSpec((1, Fop), lambda b, r: (0, 0)),
        ],
        out_specs=pl.BlockSpec((1, TM, Fop), lambda b, r: (b, r, 0)),
        scratch_shapes=[pltpu.VMEM((Np, Fop), compute_dtype)],  # support = x@W
    )

    itemsize = jnp.dtype(compute_dtype).itemsize
    flops = 2 * B * (Np * Fip * Fop + Np * Np * Fop)
    bytes_accessed = ((x_p.size + adj_p.size + w_p.size) * itemsize
                      + b_p.size * 4 + B * Np * Fop * 4)
    cost = pl.CostEstimate(flops=flops, transcendentals=0,
                           bytes_accessed=bytes_accessed)

    out_p = pl.pallas_call(
        _gcn_kernel,
        out_shape=jax.ShapeDtypeStruct((B, Np, Fop), jnp.float32),
        grid_spec=grid_spec,
        compiler_params=pltpu.CompilerParams(
            dimension_semantics=("parallel", "arbitrary"),
            vmem_limit_bytes=48 * 1024 * 1024),
        cost_estimate=cost,
    )(x_p, adj_p, w_p, b_p)

    # Slice padding back off.
    return out_p[:, :N, :Fout]


def graph_convolution_reference(x, adj, weight, bias=None):
    support = jnp.einsum("bni,io->bno", x, weight)
    out = jnp.einsum("bnm,bmo->bno", adj, support)
    if bias is not None:
        out = out + bias
    return out


if __name__ == "__main__":
    key = jax.random.PRNGKey(0)
    B, N, Fin, Fout = 2, 16, 32, 8

    k_x, k_adj, k_w, k_b = jax.random.split(key, 4)
    x = jax.random.normal(k_x, (B, N, Fin), dtype=jnp.float32)
    adj = jax.random.uniform(k_adj, (B, N, N), dtype=jnp.float32)

    # Deterministic init matching GraphConvolution.reset_parameters:
    # uniform(-stdv, stdv) with stdv = 1/sqrt(out_features)
    stdv = 1.0 / math.sqrt(Fout)
    weight = jax.random.uniform(
        k_w, (Fin, Fout), minval=-stdv, maxval=stdv, dtype=jnp.float32)
    bias = jax.random.uniform(
        k_b, (Fout,), minval=-stdv, maxval=stdv, dtype=jnp.float32)

    out_ref = graph_convolution_reference(x, adj, weight, bias)

    # Default f32 path: must match the PyTorch forward to 1e-4.
    out = graph_convolution_forward(x, adj, weight, bias)
    jax.block_until_ready(out)
    assert out.shape == (B, N, Fout), f"bad shape {out.shape}"
    assert jnp.allclose(out, out_ref, atol=1e-4, rtol=1e-4), "f32 output mismatch"

    # Optional bf16-ingest path (halves adj HBM bytes; f32 MXU accumulation).
    out_bf16 = graph_convolution_forward(x, adj, weight, bias,
                                         compute_dtype=jnp.bfloat16)
    jax.block_until_ready(out_bf16)
    assert out_bf16.shape == (B, N, Fout), f"bad shape {out_bf16.shape}"
    assert jnp.allclose(out_bf16, out_ref, atol=5e-2, rtol=5e-2), \
        "bf16 output mismatch"

    print("KERNEL_OK")
</pallas_src>

<mosaic_0001>
module attributes {stable_mosaic.version = 11 : i64} {
  func.func @_gcn_kernel(%arg0: i32, %arg1: i32, %arg2: memref<1x16x128xf32, #tpu.memory_space<vmem>>, %arg3: memref<1x16x16xf32, #tpu.memory_space<vmem>>, %arg4: memref<128x128xf32, #tpu.memory_space<vmem>>, %arg5: memref<1x128xf32, #tpu.memory_space<vmem>>, %arg6: memref<1x16x128xf32, #tpu.memory_space<vmem>>, %arg7: memref<16x128xf32, #tpu.memory_space<vmem>>) attributes {dimension_semantics = [#tpu.dimension_semantics<parallel>, #tpu.dimension_semantics<arbitrary>], iteration_bounds = array<i64: 2, 1>, scalar_prefetch = 0 : i64, scratch_operands = 1 : i64, tpu.core_type = #tpu.core_type<tc>, window_params = [{transform_indices = @transform_0, window_bounds = array<i64: 1, 16, 128>}, {transform_indices = @transform_1, window_bounds = array<i64: 1, 16, 16>}, {pipeline_mode = #tpu.pipeline_mode<synchronous>, transform_indices = @transform_2, window_bounds = array<i64: 128, 128>}, {pipeline_mode = #tpu.pipeline_mode<synchronous>, transform_indices = @transform_3, window_bounds = array<i64: 1, 128>}, {transform_indices = @transform_4, window_bounds = array<i64: 1, 16, 128>}]} {
    %c0_i32 = arith.constant 0 : i32
    %0 = arith.cmpi eq, %arg1, %c0_i32 : i32
    %1 = arith.extui %0 : i1 to i32
    %c0_i32_0 = arith.constant 0 : i32
    %2 = arith.cmpi ne, %1, %c0_i32_0 : i32
    scf.if %2 {
      %c0_10 = arith.constant 0 : index
      %c0_11 = arith.constant 0 : index
      %c0_12 = arith.constant 0 : index
      %13 = vector.load %arg2[%c0_10, %c0_11, %c0_12] : memref<1x16x128xf32, #tpu.memory_space<vmem>>, vector<1x16x128xf32>
      %14 = vector.shape_cast %13 : vector<1x16x128xf32> to vector<16x128xf32>
      %c0_13 = arith.constant 0 : index
      %c0_14 = arith.constant 0 : index
      %15 = vector.load %arg4[%c0_13, %c0_14] : memref<128x128xf32, #tpu.memory_space<vmem>>, vector<128x128xf32>
      %cst_15 = arith.constant dense<0.000000e+00> : vector<16x128xf32>
      %16 = tpu.matmul %14, %15, %cst_15 {dimension_numbers = #tpu.dot_dimension_numbers<[1], [0], [0], [1], [0, 0, 1, 1], [], []>} : vector<16x128xf32>, vector<128x128xf32>, vector<16x128xf32> -> vector<16x128xf32>
      %c0_16 = arith.constant 0 : index
      %c0_17 = arith.constant 0 : index
      %17 = vector.load %arg7[%c0_16, %c0_17] : memref<16x128xf32, #tpu.memory_space<vmem>>, vector<16x128xf32>
      tpu.vector_store %arg7[%c0_16, %c0_17], %16 {strides = array<i32>} : memref<16x128xf32, #tpu.memory_space<vmem>>, vector<16x128xf32>,
    } else {
    }
    %c0 = arith.constant 0 : index
    %c0_1 = arith.constant 0 : index
    %c0_2 = arith.constant 0 : index
    %3 = vector.load %arg3[%c0, %c0_1, %c0_2] : memref<1x16x16xf32, #tpu.memory_space<vmem>>, vector<1x16x16xf32>
    %4 = vector.shape_cast %3 : vector<1x16x16xf32> to vector<16x16xf32>
    %c0_3 = arith.constant 0 : index
    %c0_4 = arith.constant 0 : index
    %5 = vector.load %arg7[%c0_3, %c0_4] : memref<16x128xf32, #tpu.memory_space<vmem>>, vector<16x128xf32>
    %cst = arith.constant dense<0.000000e+00> : vector<16x128xf32>
    %6 = tpu.matmul %4, %5, %cst {dimension_numbers = #tpu.dot_dimension_numbers<[1], [0], [0], [1], [0, 0, 1, 1], [], []>} : vector<16x16xf32>, vector<16x128xf32>, vector<16x128xf32> -> vector<16x128xf32>
    %c0_5 = arith.constant 0 : index
    %c0_6 = arith.constant 0 : index
    %7 = vector.load %arg5[%c0_5, %c0_6] : memref<1x128xf32, #tpu.memory_space<vmem>>, vector<1x128xf32>
    %8 = vector.broadcast %7 : vector<1x128xf32> to vector<16x128xf32>
    %9 = arith.addf %6, %8 : vector<16x128xf32>
    %c0_7 = arith.constant 0 : index
    %c0_8 = arith.constant 0 : index
    %c0_9 = arith.constant 0 : index
    %10 = vector.load %arg6[%c0_7, %c0_8, %c0_9] : memref<1x16x128xf32, #tpu.memory_space<vmem>>, vector<1x16x128xf32>
    %11 = vector.shape_cast %10 : vector<1x16x128xf32> to vector<16x128xf32>
    %12 = vector.shape_cast %9 : vector<16x128xf32> to vector<1x16x128xf32>
    tpu.vector_store %arg6[%c0_7, %c0_8, %c0_9], %12 {strides = array<i32>} : memref<1x16x128xf32, #tpu.memory_space<vmem>>, vector<1x16x128xf32>,
    return
  }
  func.func @transform_0(%arg0: i32, %arg1: i32) -> (i32, i32, i32) {
    %c0_i32 = arith.constant 0 : i32
    %c0_i32_0 = arith.constant 0 : i32
    %c0_i32_1 = arith.constant 0 : i32
    return %arg0, %c0_i32, %c0_i32_0 : i32, i32, i32
  }
  func.func @transform_1(%arg0: i32, %arg1: i32) -> (i32, i32, i32) {
    %c0_i32 = arith.constant 0 : i32
    %c0_i32_0 = arith.constant 0 : i32
    return %arg0, %arg1, %c0_i32 : i32, i32, i32
  }
  func.func @transform_2(%arg0: i32, %arg1: i32) -> (i32, i32) {
    %c0_i32 = arith.constant 0 : i32
    %c0_i32_0 = arith.constant 0 : i32
    %c0_i32_1 = arith.constant 0 : i32
    return %c0_i32, %c0_i32_0 : i32, i32
  }
  func.func @transform_3(%arg0: i32, %arg1: i32) -> (i32, i32) {
    %c0_i32 = arith.constant 0 : i32
    %c0_i32_0 = arith.constant 0 : i32
    %c0_i32_1 = arith.constant 0 : i32
    return %c0_i32, %c0_i32_0 : i32, i32
  }
  func.func @transform_4(%arg0: i32, %arg1: i32) -> (i32, i32, i32) {
    %c0_i32 = arith.constant 0 : i32
    %c0_i32_0 = arith.constant 0 : i32
    return %arg0, %arg1, %c0_i32 : i32, i32, i32
  }
}

</mosaic_0001>

<bundles_post_ra>
// kernel: tpu_custom_call.1
= control target key start
LH: loop header
LB: loop body
LE: loop exit
PB: predicated region body
PF: predicated region fallthrough
CT: control target
= control target key end

     0   :  { %s1323_s0 = inlined_call_operand.hbm [shape: f32[2,16,128], index: 0, kind: input, shape index: {}]   ;;  %s1324_s1 = inlined_call_operand.hbm [shape: f32[2,16,16], index: 1, kind: input, shape index: {}]   ;;  %s1325_s2 = inlined_call_operand.hbm [shape: f32[128,128], index: 2, kind: input, shape index: {}]   ;;  %s1326_s3 = inlined_call_operand.vmem [shape: f32[1,128], index: 3, kind: input, shape index: {}]   ;;  %s1327_s4 = inlined_call_operand.hbm [shape: f32[2,16,128], index: 4, kind: output, shape index: {}]  }
   0x1   :  { %1336 = sst [smem:[#allocation15_spill]] %s1323_s0 }
   0x2   :  { %1337 = sst [smem:[#allocation16_spill]] %s1325_s2 }
   0x3   :  { %9 = vsyncpa [#allocation4], 0 }
   0x4   :  { %11 = vsyncpa [#allocation4 + $0x1], 0 }
   0x5   :  { %12 = vsyncpa [#allocation7], 0 }
   0x6   :  { %14 = vsyncpa [#allocation7 + $0x1], 0 }
   0x7   :  { %15 = vsyncpa [#allocation5], 0 }
   0x8   :  { %17 = vsyncpa [#allocation5 + $0x1], 0  ;;  %s1041_s15 = smov 0   ;;  %s1043_s16 = smov 0  }
   0x9   :  { %s1045_s17 = smov 0   ;;  %s1047_s18 = smov 0  }
   0xa   :  { %s1049_s19 = smov 0   ;;  %s1051_s20 = smov 0  }
   0xb LB: > { %s1072_s21 = sadd.s32 4294967295, %s1006_s20   ;;  %s620_s22 = sadd.s32 4294967294, %s1006_s20   ;;  %s1006_s20 = sphi %s1051_s20, %s23_s20   ;;  %s1002_s19 = sphi %s1049_s19, %s1362_s19   ;;  %s998_s18 = sphi %s1047_s18, %s1361_s18   ;;  %s994_s17 = sphi %s1045_s17, %s1360_s17   ;;  %s990_s16 = sphi %s1043_s16, %s1359_s16   ;;  %s986_s15 = sphi %s1041_s15, %s1358_s15  }
   0xc   : > { %p55_p0 = scmp.ne.s32.totalorder %s990_s16, %s986_s15  ;;  %p1328_p1 = scmp.eq.s32.totalorder %s1072_s21, 0 }
   0xd   : > { %p157_p3 = scmp.eq.s32.totalorder %s620_s22, 1  ;;  %p621_p5 = scmp.ge.s32.totalorder %s1006_s20, 1 }
   0xe   : > { %p1081_p4 = por %p1328_p1, %p55_p0  ;;  %p164_p7 = scmp.lt.s32.totalorder %s1006_s20, 3 }
   0xf   : > { %p1086_p6 = por %p157_p3, %p55_p0  ;;  %s1008_s26 = smov [#allocation8]  }
  0x10   : > { %s1338_s23 = scalar_select %p1081_p4, 1, 0 }
  0x11   : > { %s1339_s24 = scalar_select %p1086_p6, 1, 0 }
  0x12   : > { %p1091_p8 = pnand %p621_p5, %p164_p7  ;;  %s176_s27 = sshll.u32 %s1008_s26, 4  ;;  %s177_s27 = int_to_ptr.vmem [resolvable:$true] %s176_s27 }
  0x13   : > { %s35_s29 = sadd.s32 1, %s1002_s19  ;;  %s1342_s2 = sld [smem:[#allocation16_spill]] }
  0x14   : > { %s1340_s25 = scalar_select %p1091_p8, 1, 0 }
  0x15   : > { %p756_p9 = pneg %p1091_p8 }
  0x17   : > { %p1100_p11 = pnand %p756_p9, %p1328_p1 }
  0x19   : > { %s828_s6 = scalar_lea.hbm %s1342_s2, 2048  ;;  %p830_p13 = pneg %p1100_p11 }
  0x1a   : > { %p829_p12 = scmp.ne.s32.totalorder %s1342_s2, %s828_s6  ;;  %p835_p5 = scmp.lt.u32.totalorder %s828_s6, %s1342_s2 }
  0x1c   : > { %p831_p0 = pnand %p830_p13, %p829_p12 }
  0x1e   : > { %p832_p3 = pneg %p831_p0 }
  0x20   : > { %p837_p7 = pnand %p835_p5, %p832_p3 }
  0x22   : > { %840 = shalt.err (!%p837_p7)
}
  0x23   : > { %s841_s11 = scalar_lea.vmem %s177_s27, 2048  ;;  %p849_p2 = scmp.lt.s32.totalorder %s177_s27, %s177_s27 }
  0x24   : > { %p842_p9 = scmp.ne.s32.totalorder %s177_s27, %s841_s11  ;;  %p850_p6 = scmp.lt.s32.totalorder %s841_s11, %s841_s11 }
  0x26   : > { %p844_p10 = pnand %p842_p9, %p830_p13  ;;  %p851_p4 = por %p850_p6, %p849_p2 }
  0x28   : > { %p845_p1 = pneg %p844_p10 }
  0x2a   : > { %p852_p8 = pnand %p851_p4, %p845_p1 }
  0x2c   : > { %855 = shalt.err (!%p852_p8)
}
  0x2d   : > { %s1331_s12 = smov 128   ;;  %s1333_s13 = smov 8  }
  0x2e   : > { %759 = dma.hbm_to_vmem [thread:$0]  (!%p1100_p11), %s1342_s2, 2048, %s177_s27, [#allocation7], %s1331_s12, %s1331_s12, %s1333_s13  }
  0x2f   : > { %p37_p1 = scmp.ge.s32.totalorder %s35_s29, 2  ;;  %s42_s26 = sadd.s32 1, %s994_s17 }
  0x30   : > { %p49_p2 = scmp.ne.s32.totalorder %s994_s17, %s990_s16  ;;  %p50_p4 = scmp.eq.s32.totalorder %s1006_s20, 0 }
  0x31   : > { %s1364_s29 = smov (%p37_p1, %s35_s29), 0  ;;  %p1345_p8 = scmp.eq.s32.totalorder %s1072_s21, 1 }
  0x32   : > { %1343 = sst [smem:[#allocation14_spill]] %s1364_s29  ;;  %p1130_p6 = por %p50_p4, %p49_p2 }
  0x33   : > { %p1136_p10 = por %p1345_p8, %p49_p2  ;;  %s39_s5 = ssub.s32 %s1002_s19, %s1364_s29 }
  0x34   : > { %p772_p12 = scmp.lt.s32.totalorder %s1006_s20, 2  ;;  %p40_p11 = scmp.eq.s32.totalorder %s39_s5, 0 }
  0x35   : > { %s193_s27 = sand.u32 1, %s994_s17   ;;  %s643_s8 = sshll.u32 %s1002_s19, 8 }
  0x36   : > { %s624_s6 = sshll.u32 %s193_s27, 4  ;;  %s1347_s0 = sld [smem:[#allocation15_spill]] }
  0x37   : > { %s1145_s7 = scalar_select %p40_p11, %s994_s17, %s42_s26  }
  0x38   : > { %s197_s14 = scalar_lea.vmem [#allocation3], %s624_s6  ;;  %p1157_p13 = pnand %p772_p12, %p1130_p6 }
  0x39   : > { %s204_s22 = sshll.u32 %s197_s14, 4  ;;  %s1164_s9 = scalar_lea.hbm %s1324_s1, %s643_s8  ;;  %s1153_s22 = int_to_ptr.vmem [resolvable:$true] %s204_s22 }
  0x3a   : > { %s218_s10 = scalar_lea.vmem [#allocation6], %s624_s6  ;;  %s1168_s2 = scalar_lea.sflag [#allocation4], %s193_s27 }
  0x3b   : > { %s1166_s13 = sshll.u32 %s218_s10, 4  ;;  %p858_p3 = pneg %p1157_p13  ;;  %s1200_s13 = int_to_ptr.vmem [resolvable:$true] %s1166_s13 }
  0x3c   : > { %s1151_s11 = scalar_lea.hbm %s1347_s0, %s643_s8  ;;  %s861_s12 = scalar_lea.hbm %s1347_s0, 512 }
  0x3d   : > { %s856_s14 = scalar_lea.hbm %s1151_s11, 256  ;;  %p862_p9 = scmp.lt.u32.totalorder %s1151_s11, %s1347_s0 }
  0x3e   : > { %p857_p0 = scmp.ne.s32.totalorder %s1151_s11, %s856_s14  ;;  %p863_p1 = scmp.lt.u32.totalorder %s861_s12, %s856_s14 }
  0x3f   : > { %p865_p4 = scmp.lt.u32.totalorder %s856_s14, %s1151_s11 }
  0x40   : > { %p859_p5 = pnand %p858_p3, %p857_p0  ;;  %p864_p2 = por %p863_p1, %p862_p9 }
  0x42   : > { %p860_p7 = pneg %p859_p5  ;;  %p866_p6 = por %p865_p4, %p864_p2 }
  0x44   : > { %p867_p8 = pnand %p866_p6, %p860_p7 }
  0x46   : > { %870 = shalt.err (!%p867_p8)
}
  0x47   : > { %s871_s27 = scalar_lea.vmem %s1153_s22, 256  ;;  %s1011_s29 = smov [#allocation3]  }
  0x48   : > { %p872_p12 = scmp.ne.s32.totalorder %s1153_s22, %s871_s27  ;;  %s876_s6 = sshll.u32 %s1011_s29, 4  ;;  %s877_s6 = int_to_ptr.vmem [resolvable:$false] %s876_s6 }
  0x49   : > { %s878_s10 = scalar_lea.vmem %s877_s6, 512  ;;  %p879_p5 = scmp.lt.s32.totalorder %s1153_s22, %s877_s6 }
  0x4a   : > { %p874_p11 = pnand %p872_p12, %p858_p3  ;;  %p880_p9 = scmp.lt.s32.totalorder %s878_s10, %s871_s27 }
  0x4c   : > { %p875_p0 = pneg %p874_p11  ;;  %p881_p1 = por %p880_p9, %p879_p5 }
  0x4e   : > { %p882_p2 = pnand %p881_p1, %p875_p0 }
  0x50   : > { %885 = shalt.err (!%p882_p2)
}
  0x51   : > { %s1349_s14 = smov 8   ;;  %s1350_s30 = smov 128  }
  0x52   : > { %763 = dma.hbm_to_vmem [thread:$0]  (!%p1157_p13), %s1151_s11, 256, %s1153_s22, %s1168_s2, %s1350_s30, %s1350_s30, %s1349_s14  }
  0x53   : > { %s214_s12 = sand.u32 1, %s1006_s20   ;;  %s886_s8 = scalar_lea.hbm %s1164_s9, 256 }
  0x54   : > { %s1203_s26 = scalar_lea.sflag [#allocation7], %s214_s12  ;;  %p887_p7 = scmp.ne.s32.totalorder %s1164_s9, %s886_s8 }
  0x55   : > { %s891_s6 = scalar_lea.hbm %s1324_s1, 512  ;;  %p892_p8 = scmp.lt.u32.totalorder %s1164_s9, %s1324_s1 }
  0x56   : > { %p889_p4 = pnand %p887_p7, %p858_p3  ;;  %p893_p12 = scmp.lt.u32.totalorder %s891_s6, %s886_s8 }
  0x57   : > { %p895_p0 = scmp.lt.u32.totalorder %s886_s8, %s1164_s9 }
  0x58   : > { %p890_p6 = pneg %p889_p4  ;;  %p894_p11 = por %p893_p12, %p892_p8 }
  0x5a   : > { %p896_p5 = por %p895_p0, %p894_p11 }
  0x5c   : > { %p897_p9 = pnand %p896_p5, %p890_p6 }
  0x5e   : > { %900 = shalt.err (!%p897_p9)
}
  0x5f   : > { %s901_s2 = scalar_lea.vmem %s1200_s13, 256  ;;  %s1012_s11 = smov [#allocation6]  }
  0x60   : > { %p902_p1 = scmp.ne.s32.totalorder %s1200_s13, %s901_s2  ;;  %s906_s22 = sshll.u32 %s1012_s11, 4  ;;  %s907_s22 = int_to_ptr.vmem [resolvable:$false] %s906_s22 }
  0x61   : > { %s908_s0 = scalar_lea.vmem %s907_s22, 512  ;;  %p909_p4 = scmp.lt.s32.totalorder %s1200_s13, %s907_s22 }
  0x62   : > { %p904_p2 = pnand %p902_p1, %p858_p3  ;;  %p910_p8 = scmp.lt.s32.totalorder %s908_s0, %s901_s2 }
  0x64   : > { %p905_p7 = pneg %p904_p2  ;;  %p911_p12 = por %p910_p8, %p909_p4 }
  0x66   : > { %p912_p11 = pnand %p911_p12, %p905_p7 }
  0x68   : > { %915 = shalt.err (!%p912_p11)
}
  0x69   : > { %766 = dma.hbm_to_vmem [thread:$0]  (!%p1157_p13), %s1164_s9, 256, %s1200_s13, %s1203_s26, %s1350_s30, %s1350_s30, %s1349_s14  }
  0x6a   : > { %p1351_p3 = scmp.ne.s32.totalorder %s1340_s25, 0 }
  0x6b   : > { %s1235_s12 = sand.u32 (!%p1351_p3), 1, %s990_s16   ;;  %p1352_p6 = scmp.ne.s32.totalorder (!%p1351_p3), %s1338_s23, 0 }
  0x6c   : > { %239 = sbr.rel (%p1351_p3) target bundleno = 606 (0x25e), region = 36  ;;  %s1238_s8 = sshll.u32 (!%p1351_p3), %s1235_s12, 4 }
  0x6d   : > { %s242_s5 = scalar_lea.sflag (!%p1351_p3), [#allocation4], %s1235_s12  ;;  %s245_s27 = scalar_lea.vmem (!%p1351_p3), [#allocation3], %s1238_s8 }
  0x73   : > { %969 = dma.done.wait (%p1352_p6), %s242_s5, 256  }
  0x74   : > { %971 = vsyncadd (%p1352_p6), %s242_s5, 4294967040  ;;  %s250_s25 = sand.u32 1, %s1072_s21   ;;  %s254_s9 = scalar_lea.vmem [#allocation6], %s1238_s8 }
  0x75   : > { %s251_s13 = scalar_lea.sflag [#allocation7], %s250_s25 }
  0x76   : > { %973 = dma.done.wait (%p1352_p6), %s251_s13, 256  }
  0x77   : > { %975 = vsyncadd (%p1352_p6), %s251_s13, 4294967040  ;;  %p1353_p13 = scmp.eq.s32.totalorder %s1072_s21, 0 }
  0x79   : > { %977 = dma.done.wait (%p1353_p13), [#allocation7], 2048   ;;  %p1354_p0 = pmov %p1353_p13 }
  0x7a   : > { %v296_v0 = vld [vmem:[#allocation8] sm:$0xff]  ;;  %v297_v1 = vld [vmem:[#allocation8 + $0x8] sm:$0xff]  ;;  %v298_v2 = vld [vmem:[#allocation8 + $0x10] sm:$0xff]  ;;  %vm400_vm0 = vcmask 130048   ;;  %s287_s21 = scalar_lea.vmem [#allocation9], %s1238_s8  ;;  %s645_s26 = sshll.u32 %s998_s18, 8 }
  0x7b   : > { %979 = vsyncadd (%p1354_p0), [#allocation7], 4294965248  ;;  %v710_v3 = vpack.c.bf16 %v297_v1, %v296_v0  ;;  %v299_v4 = vld [vmem:[#allocation8 + $0x18] sm:$0xff]  ;;  %v300_v6 = vld [vmem:[#allocation8 + $0x20] sm:$0xff]  ;;  %s500_s23 = sshll.u32 %s287_s21, 4  ;;  %s1274_s10 = scalar_lea.hbm %s1327_s4, %s645_s26  ;;  %s1269_s23 = int_to_ptr.vmem [resolvable:$true] %s500_s23 }
  0x7c   : > { %v714_v5 = vpack.c.bf16 %v299_v4, %v298_v2  ;;  %v301_v7 = vld [vmem:[#allocation8 + $0x28] sm:$0xff]  ;;  %v294_v9 = vld [vmem:[%s245_s27] sm:$0xff]  ;;  %v303_v11 = vld [vmem:[#allocation8 + $0x38] sm:$0xff]  ;;  %s485_s2 = scalar_lea.sflag [#allocation5], %s1235_s12  ;;  %s916_s11 = scalar_lea.vmem %s1269_s23, 256 }
  0x7d   : > { %711 = vmatprep.subr.bf16.mxu0 %v710_v3  ;;  %v718_v8 = vpack.c.bf16 %v301_v7, %v300_v6  ;;  %v302_v10 = vld [vmem:[#allocation8 + $0x30] sm:$0xff]  ;;  %700 = vmatprep.mubr.f32.mxu0 %v294_v9  ;;  %v304_v13 = vld [vmem:[#allocation8 + $0x40] sm:$0xff]  ;;  %v305_v14 = vld [vmem:[#allocation8 + $0x48] sm:$0xff]  ;;  %p917_p5 = scmp.ne.s32.totalorder %s1269_s23, %s916_s11  ;;  %s1013_s18 = smov [#allocation9]  }
  0x7e   : > { %713 = vmatpush3.bf16.msra.mxu0 %v710_v3  ;;  %v722_v12 = vpack.c.bf16 %v303_v11, %v302_v10  ;;  %v726_v15 = vpack.c.bf16 %v305_v14, %v304_v13  ;;  %v306_v16 = vld [vmem:[#allocation8 + $0x50] sm:$0xff]  ;;  %v307_v17 = vld [vmem:[#allocation8 + $0x58] sm:$0xff]  ;;  %v308_v19 = vld [vmem:[#allocation8 + $0x60] sm:$0xff]  ;;  %s920_s22 = sshll.u32 %s1013_s18, 4  ;;  %s921_s22 = int_to_ptr.vmem [resolvable:$false] %s920_s22 }
  0x7f   : > { %715 = vmatprep.subr.bf16.mxu0 %v714_v5  ;;  %v730_v18 = vpack.c.bf16 %v307_v17, %v306_v16  ;;  %v309_v20 = vld [vmem:[#allocation8 + $0x68] sm:$0xff]  ;;  %v310_v22 = vld [vmem:[#allocation8 + $0x70] sm:$0xff]  ;;  %v311_v23 = vld [vmem:[#allocation8 + $0x78] sm:$0xff]  ;;  %p918_p9 = pnand %p917_p5, %p1136_p10  ;;  %s922_s0 = scalar_lea.vmem %s921_s22, 512 }
  0x80   : > { %v734_v21 = vpack.c.bf16 %v309_v20, %v308_v19  ;;  %v738_v24 = vpack.c.bf16 %v311_v23, %v310_v22  ;;  %v295_v25 = vld [vmem:[%s245_s27 + $0x8] sm:$0xff]  ;;  %v389_v26 = vld [vmem:[%s254_s9] sm:$0xff]  ;;  %p923_p2 = scmp.lt.s32.totalorder %s1269_s23, %s921_s22  ;;  %p924_p7 = scmp.lt.s32.totalorder %s922_s0, %s916_s11 }
  0x81   : > { %707 = vmatprep.mubr.msk.f32.mxu1 %vm400_vm0, %v389_v26  ;;  %v390_v30 = vld [vmem:[%s254_s9 + $0x8] sm:$0xff]  ;;  %v635_v31 = vld [vmem:[%s1326_s3] ss:$0 sm:$0xff]  ;;  %p919_p1 = pneg %p918_p9 }
  0x82   : > { %717 = vmatpush3.bf16.msra.mxu0 %v714_v5  ;;  %p925_p4 = por %p924_p7, %p923_p2 }
  0x83   : > { %719 = vmatprep.subr.bf16.mxu0 %v718_v8 }
  0x84   : > { %p926_p8 = pnand %p925_p4, %p919_p1 }
  0x86   : > { %721 = vmatpush3.bf16.msra.mxu0 %v718_v8 }
  0x87   : > { %723 = vmatprep.subr.bf16.mxu0 %v722_v12 }
  0x8a   : > { %725 = vmatpush3.bf16.msra.mxu0 %v722_v12 }
  0x8b   : > { %727 = vmatprep.subr.bf16.mxu0 %v726_v15 }
  0x8e   : > { %729 = vmatpush3.bf16.msra.mxu0 %v726_v15 }
  0x8f   : > { %731 = vmatprep.subr.bf16.mxu0 %v730_v18 }
  0x92   : > { %733 = vmatpush3.bf16.msra.mxu0 %v730_v18 }
  0x93   : > { %735 = vmatprep.subr.bf16.mxu0 %v734_v21 }
  0x96   : > { %737 = vmatpush3.bf16.msra.mxu0 %v734_v21 }
  0x97   : > { %739 = vmatprep.subr.bf16.mxu0 %v738_v24 }
  0x9a   : > { %741 = vmatpush3.bf16.msra.mxu0 %v738_v24 }
  0x9d   : > { %701 = vmatmul.mubr.f32.vlgmr.msra.gmra.mrb[0].mxu0 %v295_v25 }
 0x170   : > { %v702_v27 = vpop.f32.mrb[0].mxu0 }
 0x171   : > { %v378_v28 = vpop.f32.mrb[1].mxu0 }
 0x172   : > { %v742_v29 = vpack.c.bf16 %v702_v27, %v378_v28 }
 0x174   : > { %743 = vmatprep.subr.bf16.mxu1 %v742_v29 }
 0x175   : > { %745 = vmatpush3.bf16.msra.mxu1 %v742_v29 }
 0x178   : > { %708 = vmatmul.mubr.msk.f32.vlgmr.msra.gmra.mrb[0].mxu1 %vm400_vm0, %v390_v30 }
 0x24b   : > { %v709_v32 = vpop.f32.mrb[0].mxu1 }
 0x24c   : > { %v479_v33 = vadd.f32 %v709_v32, %v635_v31  ;;  %v473_v34 = vpop.f32.mrb[1].mxu1 }
 0x24d   : > { %v474_v35 = vadd.f32 %v635_v31, %v473_v34 }
 0x24e   : > { %483 = vst [vmem:[%s287_s21 + $0x8] sm:$0xff] %v479_v33 }
 0x24f   : > { %482 = vst [vmem:[%s287_s21] sm:$0xff] %v474_v35 }
 0x250   : > { %929 = shalt.err (!%p926_p8)
}
 0x251   : > { %s930_s8 = scalar_lea.hbm %s1274_s10, 256  ;;  %s934_s25 = scalar_lea.hbm %s1327_s4, 512 }
 0x252   : > { %p931_p12 = scmp.ne.s32.totalorder %s1274_s10, %s930_s8  ;;  %p935_p6 = scmp.lt.u32.totalorder %s1274_s10, %s1327_s4 }
 0x253   : > { %p936_p13 = scmp.lt.u32.totalorder %s934_s25, %s930_s8  ;;  %p938_p5 = scmp.lt.u32.totalorder %s930_s8, %s1274_s10 }
 0x254   : > { %p932_p11 = pnand %p931_p12, %p1136_p10 }
 0x255   : > { %p937_p0 = por %p936_p13, %p935_p6 }
 0x256   : > { %p933_p3 = pneg %p932_p11 }
 0x257   : > { %p939_p9 = por %p938_p5, %p937_p0 }
 0x259   : > { %p940_p1 = pnand %p939_p9, %p933_p3 }
 0x25b   : > { %943 = shalt.err (!%p940_p1)
}
 0x25c   : > { %s1014_s21 = smov 128   ;;  %s1015_s14 = smov 8  }
 0x25d   : > { %754 = dma.vmem_to_hbm [thread:$0]  (%p1136_p10), %s1269_s23, 256, %s1274_s10, %s485_s2, %s1014_s21, %s1014_s21, %s1015_s14  }
 0x25e PF: > { %s515_s30 = sand.u32 1, %s986_s15   ;;  %p1355_p2 = scmp.ne.s32.totalorder %s1339_s24, 0 }
 0x25f   : > { %p1356_p7 = scmp.ge.s32.totalorder %s1006_s20, 2  ;;  %s516_s26 = scalar_lea.sflag [#allocation5], %s515_s30 }
 0x261   : > { %p768_p4 = pnand %p1356_p7, %p1355_p2 }
 0x263   : > { %981 = dma.done.wait (!%p768_p4), %s516_s26, 256  }
 0x264   : > { %983 = vsyncadd (!%p768_p4), %s516_s26, 4294967040  ;;  %s23_s20 = sadd.s32 1, %s1006_s20   ;;  %s1357_s28 = sld [smem:[#allocation14_spill]] }
 0x265   : > { %p20_p8 = scmp.ge.s32.totalorder %s23_s20, 4   ;;  %s1358_s15 = smov %s990_s16 }
 0x266   : > { %s1359_s16 = smov %s994_s17  ;;  %s1360_s17 = smov %s1145_s7 }
 0x267   : > { %s1361_s18 = smov %s1002_s19  ;;  %22 = sbr.rel (!%p20_p8) target bundleno = 11 (0xb), region = 102 }
 0x26a   : > { %s1362_s19 = smov %s1357_s28 }
 0x26e   :  { %521 = vsyncpa [#allocation4], 1 }
 0x26f   :  { %523 = vsyncpa [#allocation4 + $0x1], 1 }
 0x270   :  { %524 = vsyncpa [#allocation7], 1 }
 0x271   :  { %526 = vsyncpa [#allocation7 + $0x1], 1 }
 0x272   :  { %527 = vsyncpa [#allocation5], 1 }
 0x273   :  { %529 = vsyncpa [#allocation5 + $0x1], 1 }

</bundles_post_ra>
